<compile_context>
chip_gen: v7x
topology: tpu7x:2x2x1
jax: 0.10.0
libtpu: 0.0.40
codegen_flags: <defaults>
</compile_context>

<pallas_src>
import jax
import jax.numpy as jnp
from jax.experimental import pallas as pl
from jax.experimental.pallas import tpu as pltpu


def _round_up(x: int, m: int) -> int:
    return ((x + m - 1) // m) * m


def _vmem_budget_bytes() -> int:
    """Generation-aware VMEM budget (fraction of physical, never the whole)."""
    try:
        cap = pltpu.get_tpu_info().vmem_capacity_bytes
    except Exception:
        cap = 64 * 1024 * 1024  # conservative: assume v7x-sized VMEM
    return int(cap * 3 // 4)    # 48 MiB on v7x, 96 MiB on v5e/v6e


def _working_set_bytes(tm: int, tn: int, K: int, in_itemsize: int) -> int:
    x_bytes = 2 * tm * K * in_itemsize   # double-buffered activation tile
    w_bytes = 2 * K * tn * in_itemsize   # resident weight slab (counted x2, conservative)
    b_bytes = 2 * tn * 4                 # bias tile
    o_bytes = 2 * tm * tn * 4            # double-buffered f32 output tile
    return x_bytes + w_bytes + b_bytes + o_bytes


def _select_tiles(M: int, K: int, N: int, in_itemsize: int, vmem_budget: int):
    """Pick (tm, tn): prefer full-N resident weight and tm=512 row tiles."""
    headroom = vmem_budget - (2 << 20)   # leave room for Mosaic internal scratch
    tn_candidates = [N] + [t for t in (512, 256, 128) if t < N and N % t == 0]
    for tn in tn_candidates:
        tm = min(512, _round_up(M, 8))
        while True:
            if _working_set_bytes(tm, tn, K, in_itemsize) <= headroom:
                return tm, tn
            if tm <= 8:
                break
            tm = max(8, _round_up(tm // 2, 8))
    return 8, tn_candidates[-1]


def _patch_embed_kernel(x_ref, w_ref, b_ref, o_ref):
    # x_ref: (tm, K) patch rows; w_ref: (K, tn) resident weight;
    # b_ref: (1, tn) f32 bias; o_ref: (tm, tn) f32 output.
    o_ref[...] = (
        jnp.dot(x_ref[...], w_ref[...], preferred_element_type=jnp.float32)
        + b_ref[...]
    ).astype(o_ref.dtype)


def patch_embed(images, weight, bias, *, patch_size, compute_dtype=None):
    """images: (B, C, H, W); weight: (K, N) with K = C*ph*pw; bias: (N,).

    Returns (B, num_patches, N) f32, matching PatchEmbed.forward
    (nn.Linear computes x @ W.T; here weight is stored already transposed
    as (K, N) so the kernel does a plain (M,K) x (K,N) matmul).
    """
    B, C, H, W = images.shape
    ph = pw = patch_size
    h, w = H // ph, W // pw
    K = C * ph * pw
    N = weight.shape[1]
    M = B * h * w

    # Glue: einops 'b c (h ph) (w pw) -> b (h w) (c ph pw)'; materialized once
    # so the kernel's input DMA reads contiguous (tm, K) rows.
    patches = images.reshape(B, C, h, ph, w, pw)
    patches = jnp.transpose(patches, (0, 2, 4, 1, 3, 5))  # (B, h, w, C, ph, pw)
    x2d = patches.reshape(M, K)

    if compute_dtype is not None:
        x2d = x2d.astype(compute_dtype)
        weight = weight.astype(compute_dtype)
    in_itemsize = jnp.dtype(x2d.dtype).itemsize

    vmem_budget = _vmem_budget_bytes()
    tm, tn = _select_tiles(M, K, N, in_itemsize, vmem_budget)

    # Grid: N-tile axis OUTER (weight index depends only on it -> weight stays
    # resident across all M tiles), M-tile axis inner with a cdiv (ragged last
    # block is masked by Pallas -- no padding / slicing of the activations).
    grid = (N // tn, pl.cdiv(M, tm))

    b2d = bias.reshape(1, N).astype(jnp.float32)

    cost = pl.CostEstimate(
        flops=2 * M * K * N,
        transcendentals=0,
        bytes_accessed=in_itemsize * (M * K + K * N) + 4 * (M * N + N),
    )

    out2d = pl.pallas_call(
        _patch_embed_kernel,
        out_shape=jax.ShapeDtypeStruct((M, N), jnp.float32),
        grid=grid,
        in_specs=[
            pl.BlockSpec((tm, K), lambda j, i: (i, 0)),   # patch rows (streamed)
            pl.BlockSpec((K, tn), lambda j, i: (0, j)),   # weight (VMEM-resident)
            pl.BlockSpec((1, tn), lambda j, i: (0, j)),   # bias
        ],
        out_specs=pl.BlockSpec((tm, tn), lambda j, i: (i, j)),
        compiler_params=pltpu.CompilerParams(
            dimension_semantics=("parallel", "parallel"),
            vmem_limit_bytes=vmem_budget,
        ),
        cost_estimate=cost,
    )(x2d, weight, b2d)

    return out2d.reshape(B, h * w, N)


def _reference(images, weight, bias, *, patch_size):
    B, C, H, W = images.shape
    h, w = H // patch_size, W // patch_size
    K = C * patch_size * patch_size
    p = images.reshape(B, C, h, patch_size, w, patch_size)
    p = jnp.transpose(p, (0, 2, 4, 1, 3, 5)).reshape(B, h * w, K)
    return (
        jnp.einsum("bpk,kn->bpn", p, weight, precision=jax.lax.Precision.HIGHEST)
        + bias
    )


if __name__ == "__main__":
    key = jax.random.PRNGKey(0)

    # (B, C, H, W, patch_size, embed_dim, compute_dtype, tol) — exercising:
    #   1) tiny single-tile grid, 2) large untiled K (3072) with resident
    #   weight, 3) ragged M (640 rows vs tm=512 -> masked last block),
    #   4) bf16 input/weight streams with f32 accumulation.
    configs = [
        (2, 3, 32, 32, 8, 256, None, 1e-3),
        (4, 3, 64, 64, 32, 1024, None, 1e-3),
        (40, 3, 32, 32, 8, 768, None, 1e-3),
        (40, 3, 32, 32, 8, 768, jnp.bfloat16, 2e-2),
    ]

    for (B, C, H, W, patch_size, embed_dim, compute_dtype, tol) in configs:
        K = C * patch_size * patch_size
        k_img, k_w, k_b, key = jax.random.split(key, 4)

        images = jax.random.normal(k_img, (B, C, H, W), dtype=jnp.float32)

        # Deterministic nn.Linear-style init: U(-1/sqrt(K), 1/sqrt(K)).
        bound = 1.0 / jnp.sqrt(jnp.float32(K))
        weight = jax.random.uniform(
            k_w, (K, embed_dim), dtype=jnp.float32, minval=-bound, maxval=bound
        )
        bias = jax.random.uniform(
            k_b, (embed_dim,), dtype=jnp.float32, minval=-bound, maxval=bound
        )

        out = patch_embed(
            images, weight, bias, patch_size=patch_size, compute_dtype=compute_dtype
        )
        out = jax.block_until_ready(out)

        ref = _reference(images, weight, bias, patch_size=patch_size)
        num_patches = (H // patch_size) * (W // patch_size)
        assert out.shape == (B, num_patches, embed_dim), out.shape
        assert jnp.allclose(out, ref, atol=tol, rtol=tol), float(
            jnp.max(jnp.abs(out - ref))
        )

    print("KERNEL_OK")
</pallas_src>

<mosaic_0001>
module attributes {stable_mosaic.version = 11 : i64} {
  func.func @_patch_embed_kernel(%arg0: i32, %arg1: i32, %arg2: memref<32x192xf32, #tpu.memory_space<vmem>>, %arg3: memref<192x256xf32, #tpu.memory_space<vmem>>, %arg4: memref<1x256xf32, #tpu.memory_space<vmem>>, %arg5: memref<32x256xf32, #tpu.memory_space<vmem>>) attributes {dimension_semantics = [#tpu.dimension_semantics<parallel>, #tpu.dimension_semantics<parallel>], iteration_bounds = array<i64: 1, 1>, scalar_prefetch = 0 : i64, scratch_operands = 0 : i64, tpu.core_type = #tpu.core_type<tc>, window_params = [{transform_indices = @transform_0, window_bounds = array<i64: 32, 192>}, {transform_indices = @transform_1, window_bounds = array<i64: 192, 256>}, {transform_indices = @transform_2, window_bounds = array<i64: 1, 256>}, {transform_indices = @transform_3, window_bounds = array<i64: 32, 256>}]} {
    %c0 = arith.constant 0 : index
    %c0_0 = arith.constant 0 : index
    %0 = vector.load %arg2[%c0, %c0_0] : memref<32x192xf32, #tpu.memory_space<vmem>>, vector<32x192xf32>
    %c0_1 = arith.constant 0 : index
    %c0_2 = arith.constant 0 : index
    %1 = vector.load %arg3[%c0_1, %c0_2] : memref<192x256xf32, #tpu.memory_space<vmem>>, vector<192x256xf32>
    %cst = arith.constant dense<0.000000e+00> : vector<32x256xf32>
    %2 = tpu.matmul %0, %1, %cst {dimension_numbers = #tpu.dot_dimension_numbers<[1], [0], [0], [1], [0, 0, 1, 1], [], []>} : vector<32x192xf32>, vector<192x256xf32>, vector<32x256xf32> -> vector<32x256xf32>
    %c0_3 = arith.constant 0 : index
    %c0_4 = arith.constant 0 : index
    %3 = vector.load %arg4[%c0_3, %c0_4] : memref<1x256xf32, #tpu.memory_space<vmem>>, vector<1x256xf32>
    %4 = vector.broadcast %3 : vector<1x256xf32> to vector<32x256xf32>
    %5 = arith.addf %2, %4 : vector<32x256xf32>
    %c0_5 = arith.constant 0 : index
    %c0_6 = arith.constant 0 : index
    %6 = vector.load %arg5[%c0_5, %c0_6] : memref<32x256xf32, #tpu.memory_space<vmem>>, vector<32x256xf32>
    tpu.vector_store %arg5[%c0_5, %c0_6], %5 {strides = array<i32>} : memref<32x256xf32, #tpu.memory_space<vmem>>, vector<32x256xf32>,
    return
  }
  func.func @transform_0(%arg0: i32, %arg1: i32) -> (i32, i32) {
    %c0_i32 = arith.constant 0 : i32
    %c0_i32_0 = arith.constant 0 : i32
    return %arg1, %c0_i32 : i32, i32
  }
  func.func @transform_1(%arg0: i32, %arg1: i32) -> (i32, i32) {
    %c0_i32 = arith.constant 0 : i32
    %c0_i32_0 = arith.constant 0 : i32
    return %c0_i32, %arg0 : i32, i32
  }
  func.func @transform_2(%arg0: i32, %arg1: i32) -> (i32, i32) {
    %c0_i32 = arith.constant 0 : i32
    %c0_i32_0 = arith.constant 0 : i32
    return %c0_i32, %arg0 : i32, i32
  }
  func.func @transform_3(%arg0: i32, %arg1: i32) -> (i32, i32) {
    %c0_i32 = arith.constant 0 : i32
    return %arg1, %arg0 : i32, i32
  }
}

</mosaic_0001>

<bundles_post_ra>
// kernel: tpu_custom_call.1
= control target key start
LH: loop header
LB: loop body
LE: loop exit
PB: predicated region body
PF: predicated region fallthrough
CT: control target
= control target key end

     0   :  { %8 = vsyncpa [#allocation3], 0  ;;  %s469_s0 = inlined_call_operand.hbm [shape: f32[32,192], index: 0, kind: input, shape index: {}]   ;;  %s470_s1 = inlined_call_operand.hbm [shape: f32[192,256], index: 1, kind: input, shape index: {}]   ;;  %s471_s2 = inlined_call_operand.vmem [shape: f32[1,256], index: 2, kind: input, shape index: {}]   ;;  %s472_s3 = inlined_call_operand.hbm [shape: f32[32,256], index: 3, kind: output, shape index: {}]  }
   0x1   :  { %9 = vsyncpa [#allocation6], 0 }
   0x2   :  { %10 = vsyncpa [#allocation4], 0  ;;  %s392_s12 = smov [#allocation2]   ;;  %s320_s16 = scalar_lea.hbm %s469_s0, 1024 }
   0x3   :  { %s16_s13 = sshll.u32 %s392_s12, 4  ;;  %p321_p0 = scmp.ne.s32.totalorder %s469_s0, %s320_s16  ;;  %s17_s13 = int_to_ptr.vmem [resolvable:$true] %s16_s13 }
   0x4   :  { %p324_p1 = scmp.lt.u32.totalorder %s320_s16, %s469_s0 }
   0x6   :  { %p326_p2 = pnand %p324_p1, %p321_p0 }
   0x8   :  { %329 = shalt.err (!%p326_p2)
}
   0x9   :  { %s330_s21 = scalar_lea.vmem %s17_s13, 1024  ;;  %p335_p4 = scmp.lt.s32.totalorder %s17_s13, %s17_s13 }
   0xa   :  { %p331_p3 = scmp.ne.s32.totalorder %s17_s13, %s330_s21  ;;  %p336_p5 = scmp.lt.s32.totalorder %s330_s21, %s330_s21 }
   0xc   :  { %p337_p6 = por %p336_p5, %p335_p4 }
   0xe   :  { %p338_p7 = pnand %p337_p6, %p331_p3 }
  0x10   :  { %341 = shalt.err (!%p338_p7)
}
  0x11   :  { %s393_s22 = smov 256   ;;  %s394_s23 = smov 16  }
  0x12   :  { %22 = dma.hbm_to_vmem [thread:$0]  %s469_s0, 1024, %s17_s13, [#allocation3], %s393_s22, %s393_s22, %s394_s23  }
  0x13   :  { %s395_s26 = smov [#allocation5]   ;;  %s342_s30 = scalar_lea.hbm %s470_s1, 6144 }
  0x14   :  { %s28_s27 = sshll.u32 %s395_s26, 4  ;;  %p343_p8 = scmp.ne.s32.totalorder %s470_s1, %s342_s30  ;;  %s29_s27 = int_to_ptr.vmem [resolvable:$true] %s28_s27 }
  0x15   :  { %p346_p9 = scmp.lt.u32.totalorder %s342_s30, %s470_s1 }
  0x17   :  { %p348_p10 = pnand %p346_p9, %p343_p8 }
  0x19   :  { %351 = shalt.err (!%p348_p10)
}
  0x1a   :  { %s352_s8 = scalar_lea.vmem %s29_s27, 6144  ;;  %p357_p12 = scmp.lt.s32.totalorder %s29_s27, %s29_s27 }
  0x1b   :  { %p353_p11 = scmp.ne.s32.totalorder %s29_s27, %s352_s8  ;;  %p358_p13 = scmp.lt.s32.totalorder %s352_s8, %s352_s8 }
  0x1d   :  { %p359_p0 = por %p358_p13, %p357_p12 }
  0x1f   :  { %p360_p1 = pnand %p359_p0, %p353_p11 }
  0x21   :  { %363 = shalt.err (!%p360_p1)
}
  0x22   :  { %34 = dma.hbm_to_vmem [thread:$0]  %s470_s1, 6144, %s29_s27, [#allocation6], %s393_s22, %s393_s22, %s394_s23  }
  0x23   :  { %386 = dma.done.wait [#allocation3], 1024  }
  0x24   :  { %387 = vsyncadd [#allocation3], 4294966272 }
  0x25   :  { %388 = dma.done.wait [#allocation6], 6144  }
  0x26   :  { %389 = vsyncadd [#allocation6], 4294961152  ;;  %v52_v0 = vld [vmem:[#allocation5 + $0x8] sm:$0xff]  ;;  %v54_v1 = vld [vmem:[#allocation5 + $0x18] sm:$0xff]  ;;  %vm111_vm0 = vcmask 523264   ;;  %s396_s11 = smov [#allocation7]  }
  0x27   :  { %v51_v2 = vld [vmem:[#allocation5] sm:$0xff]  ;;  %v243_v3 = vpack.c.bf16 %v54_v1, %v52_v0  ;;  %v53_v4 = vld [vmem:[#allocation5 + $0x10] sm:$0xff]  ;;  %v56_v5 = vld [vmem:[#allocation5 + $0x28] sm:$0xff]  ;;  %s226_s12 = sshll.u32 %s396_s11, 4  ;;  %s227_s12 = int_to_ptr.vmem [resolvable:$true] %s226_s12 }
  0x28   :  { %v58_v6 = vld [vmem:[#allocation5 + $0x38] sm:$0xff]  ;;  %v245_v7 = vpack.c.bf16 %v53_v4, %v51_v2  ;;  %v55_v9 = vld [vmem:[#allocation5 + $0x20] sm:$0xff]  ;;  %v57_v10 = vld [vmem:[#allocation5 + $0x30] sm:$0xff]  ;;  %p369_p3 = scmp.lt.s32.totalorder %s227_s12, %s227_s12 }
  0x29   :  { %v247_v8 = vpack.c.bf16 %v58_v6, %v56_v5  ;;  %v60_v11 = vld [vmem:[#allocation5 + $0x48] sm:$0xff]  ;;  %244 = vmatprep.subr.bf16.mxu0 %v243_v3  ;;  %291 = vmatprep.subr.bf16.mxu1 %v243_v3  ;;  %v62_v12 = vld [vmem:[#allocation5 + $0x58] sm:$0xff]  ;;  %v249_v13 = vpack.c.bf16 %v57_v10, %v55_v9  ;;  %v59_v15 = vld [vmem:[#allocation5 + $0x40] sm:$0xff] }
  0x2a   :  { %246 = vmatpush1.bf16.msra.mxu0 %v245_v7  ;;  %303 = vmatpush1.bf16.msra.mxu1 %v245_v7  ;;  %v251_v14 = vpack.c.bf16 %v62_v12, %v60_v11  ;;  %v61_v16 = vld [vmem:[#allocation5 + $0x50] sm:$0xff]  ;;  %v64_v17 = vld [vmem:[#allocation5 + $0x68] sm:$0xff]  ;;  %v66_v18 = vld [vmem:[#allocation5 + $0x78] sm:$0xff] }
  0x2b   :  { %248 = vmatprep.subr.bf16.mxu0 %v247_v8  ;;  %292 = vmatprep.subr.bf16.mxu1 %v247_v8  ;;  %v253_v19 = vpack.c.bf16 %v61_v16, %v59_v15  ;;  %v255_v20 = vpack.c.bf16 %v66_v18, %v64_v17  ;;  %v63_v21 = vld [vmem:[#allocation5 + $0x60] sm:$0xff]  ;;  %v65_v22 = vld [vmem:[#allocation5 + $0x70] sm:$0xff]  ;;  %v68_v23 = vld [vmem:[#allocation5 + $0x88] sm:$0xff]  ;;  %v101_v16 = vlaneseq }
  0x2c   :  { %v70_v24 = vld [vmem:[#allocation5 + $0x98] sm:$0xff]  ;;  %v257_v25 = vpack.c.bf16 %v65_v22, %v63_v21  ;;  %v67_v27 = vld [vmem:[#allocation5 + $0x80] sm:$0xff]  ;;  %v69_v28 = vld [vmem:[#allocation5 + $0x90] sm:$0xff] }
  0x2d   :  { %v259_v26 = vpack.c.bf16 %v70_v24, %v68_v23  ;;  %v72_v29 = vld [vmem:[#allocation5 + $0xa8] sm:$0xff]  ;;  %v74_v30 = vld [vmem:[#allocation5 + $0xb8] sm:$0xff]  ;;  %v261_v31 = vpack.c.bf16 %v69_v28, %v67_v27  ;;  %v71_v35 = vld [vmem:[#allocation5 + $0xa0] sm:$0xff]  ;;  %v102_v17 = vshrl.u32 %v101_v16, 7 }
  0x2e   :  { %250 = vmatpush1.bf16.msra.mxu0 %v249_v13  ;;  %304 = vmatpush1.bf16.msra.mxu1 %v249_v13  ;;  %v44_v32 = vld [vmem:[#allocation2 + $0x8] sm:$0xff]  ;;  %v263_v34 = vpack.c.bf16 %v74_v30, %v72_v29  ;;  %v73_v36 = vld [vmem:[#allocation5 + $0xb0] sm:$0xff]  ;;  %v78_v38 = vld [vmem:[#allocation5 + $0xd8] sm:$0xff] }
  0x2f   :  { %252 = vmatprep.subr.bf16.mxu0 %v251_v14  ;;  %293 = vmatprep.subr.bf16.mxu1 %v251_v14  ;;  %v48_v33 = vld [vmem:[#allocation2 + $0x28] sm:$0xff]  ;;  %v265_v39 = vpack.c.bf16 %v73_v36, %v71_v35  ;;  %v75_v41 = vld [vmem:[#allocation5 + $0xc0] sm:$0xff]  ;;  %v77_v42 = vld [vmem:[#allocation5 + $0xd0] sm:$0xff]  ;;  %v103_v18 = vsub.s32 0, %v102_v17 }
  0x30   :  { %v76_v37 = vld [vmem:[#allocation5 + $0xc8] sm:$0xff]  ;;  %239 = vmatprep.mubr.msk.f32.mxu0 %vm111_vm0, %v44_v32  ;;  %241 = vmatprep.mubr.msk.f32.mxu1 %vm111_vm0, %v48_v33  ;;  %v82_v44 = vld [vmem:[#allocation5 + $0xf8] sm:$0xff]  ;;  %v269_v45 = vpack.c.bf16 %v77_v42, %v75_v41  ;;  %v79_v47 = vld [vmem:[#allocation5 + $0xe0] sm:$0xff] }
  0x31   :  { %v267_v40 = vpack.c.bf16 %v78_v38, %v76_v37  ;;  %v80_v43 = vld [vmem:[#allocation5 + $0xe8] sm:$0xff]  ;;  %v81_v48 = vld [vmem:[#allocation5 + $0xf0] sm:$0xff]  ;;  %v86_v50 = vld [vmem:[#allocation5 + $0x118] sm:$0xff] }
  0x32   :  { %254 = vmatpush1.bf16.msra.mxu0 %v253_v19  ;;  %305 = vmatpush1.bf16.msra.mxu1 %v253_v19  ;;  %v271_v46 = vpack.c.bf16 %v82_v44, %v80_v43  ;;  %v84_v49 = vld [vmem:[#allocation5 + $0x108] sm:$0xff]  ;;  %v273_v51 = vpack.c.bf16 %v81_v48, %v79_v47  ;;  %v83_v53 = vld [vmem:[#allocation5 + $0x100] sm:$0xff]  ;;  %v85_v54 = vld [vmem:[#allocation5 + $0x110] sm:$0xff] }
  0x33   :  { %256 = vmatprep.subr.bf16.mxu0 %v255_v20  ;;  %294 = vmatprep.subr.bf16.mxu1 %v255_v20  ;;  %v275_v52 = vpack.c.bf16 %v86_v50, %v84_v49  ;;  %v88_v55 = vld [vmem:[#allocation5 + $0x128] sm:$0xff]  ;;  %v90_v56 = vld [vmem:[#allocation5 + $0x138] sm:$0xff]  ;;  %v277_v57 = vpack.c.bf16 %v85_v54, %v83_v53  ;;  %v87_v59 = vld [vmem:[#allocation5 + $0x120] sm:$0xff]  ;;  %v107_v20 = vsub.s32 1, %v102_v17 }
  0x34   :  { %v279_v58 = vpack.c.bf16 %v90_v56, %v88_v55  ;;  %v89_v60 = vld [vmem:[#allocation5 + $0x130] sm:$0xff]  ;;  %v92_v61 = vld [vmem:[#allocation5 + $0x148] sm:$0xff]  ;;  %v94_v62 = vld [vmem:[#allocation5 + $0x158] sm:$0xff] }
  0x35   :  { %v281_v63 = vpack.c.bf16 %v89_v60, %v87_v59  ;;  %v283_v0 = vpack.c.bf16 %v94_v62, %v92_v61  ;;  %v91_v1 = vld [vmem:[#allocation5 + $0x140] sm:$0xff]  ;;  %v93_v2 = vld [vmem:[#allocation5 + $0x150] sm:$0xff]  ;;  %v96_v3 = vld [vmem:[#allocation5 + $0x168] sm:$0xff] }
  0x36   :  { %258 = vmatpush1.bf16.msra.mxu0 %v257_v25  ;;  %306 = vmatpush1.bf16.msra.mxu1 %v257_v25  ;;  %v98_v4 = vld [vmem:[#allocation5 + $0x178] sm:$0xff]  ;;  %v285_v5 = vpack.c.bf16 %v93_v2, %v91_v1  ;;  %v95_v7 = vld [vmem:[#allocation5 + $0x160] sm:$0xff]  ;;  %v97_v8 = vld [vmem:[#allocation5 + $0x170] sm:$0xff] }
  0x37   :  { %260 = vmatprep.subr.bf16.mxu0 %v259_v26  ;;  %295 = vmatprep.subr.bf16.mxu1 %v259_v26  ;;  %v287_v6 = vpack.c.bf16 %v98_v4, %v96_v3  ;;  %v289_v9 = vpack.c.bf16 %v97_v8, %v95_v7  ;;  %v43_v10 = vld [vmem:[#allocation2] sm:$0xff]  ;;  %v46_v12 = vld [vmem:[#allocation2 + $0x18] sm:$0xff]  ;;  %v45_v14 = vld [vmem:[#allocation2 + $0x10] sm:$0xff] }
  0x38   :  { %v47_v11 = vld [vmem:[#allocation2 + $0x20] sm:$0xff]  ;;  %v50_v13 = vld [vmem:[#allocation2 + $0x38] sm:$0xff]  ;;  %v49_v15 = vld [vmem:[#allocation2 + $0x30] sm:$0xff] }
  0x39   :  { %v99_v19 = vld [vmem:[%s471_s2] sm:$0x3]  ;;  %s364_s2 = scalar_lea.vmem %s227_s12, 1024 }
  0x3a   :  { %262 = vmatpush1.bf16.msra.mxu0 %v261_v31  ;;  %307 = vmatpush1.bf16.msra.mxu1 %v261_v31  ;;  %v104_v21 = vrot.slane %v99_v19, %v103_v18  ;;  %v108_v22 = vrot.slane %v99_v19, %v107_v20  ;;  %p365_p2 = scmp.ne.s32.totalorder %s227_s12, %s364_s2  ;;  %p370_p4 = scmp.lt.s32.totalorder %s364_s2, %s364_s2 }
  0x3b   :  { %264 = vmatprep.subr.bf16.mxu0 %v263_v34  ;;  %296 = vmatprep.subr.bf16.mxu1 %v263_v34 }
  0x3c   :  { %p371_p5 = por %p370_p4, %p369_p3 }
  0x3e   :  { %266 = vmatpush1.bf16.msra.mxu0 %v265_v39  ;;  %308 = vmatpush1.bf16.msra.mxu1 %v265_v39  ;;  %p372_p6 = pnand %p371_p5, %p365_p2 }
  0x3f   :  { %268 = vmatprep.subr.bf16.mxu0 %v267_v40  ;;  %297 = vmatprep.subr.bf16.mxu1 %v267_v40 }
  0x42   :  { %270 = vmatpush1.bf16.msra.mxu0 %v269_v45  ;;  %309 = vmatpush1.bf16.msra.mxu1 %v269_v45 }
  0x43   :  { %272 = vmatprep.subr.bf16.mxu0 %v271_v46  ;;  %298 = vmatprep.subr.bf16.mxu1 %v271_v46 }
  0x46   :  { %274 = vmatpush1.bf16.msra.mxu0 %v273_v51  ;;  %310 = vmatpush1.bf16.msra.mxu1 %v273_v51 }
  0x47   :  { %276 = vmatprep.subr.bf16.mxu0 %v275_v52  ;;  %299 = vmatprep.subr.bf16.mxu1 %v275_v52 }
  0x4a   :  { %278 = vmatpush1.bf16.msra.mxu0 %v277_v57  ;;  %311 = vmatpush1.bf16.msra.mxu1 %v277_v57 }
  0x4b   :  { %280 = vmatprep.subr.bf16.mxu0 %v279_v58  ;;  %300 = vmatprep.subr.bf16.mxu1 %v279_v58 }
  0x4e   :  { %282 = vmatpush1.bf16.msra.mxu0 %v281_v63  ;;  %312 = vmatpush1.bf16.msra.mxu1 %v281_v63 }
  0x4f   :  { %284 = vmatprep.subr.bf16.mxu0 %v283_v0  ;;  %301 = vmatprep.subr.bf16.mxu1 %v283_v0 }
  0x52   :  { %286 = vmatpush1.bf16.msra.mxu0 %v285_v5  ;;  %313 = vmatpush1.bf16.msra.mxu1 %v285_v5 }
  0x53   :  { %288 = vmatprep.subr.bf16.mxu0 %v287_v6  ;;  %302 = vmatprep.subr.bf16.mxu1 %v287_v6 }
  0x56   :  { %290 = vmatpush1.bf16.msra.mxu0 %v289_v9  ;;  %314 = vmatpush1.bf16.msra.mxu1 %v289_v9 }
  0x59   :  { %189 = vmatmul.mubr.f32.vlgmr.msra.gmra.mrb[0].mxu0 %v43_v10  ;;  %201 = vmatmul.mubr.f32.vlgmr.msra.gmra.mrb[0].mxu1 %v47_v11 }
  0x5a   :  { %240 = vmatprep.mubr.msk.f32.mxu0 %vm111_vm0, %v46_v12  ;;  %242 = vmatprep.mubr.msk.f32.mxu1 %vm111_vm0, %v50_v13 }
  0x5d   :  { %195 = vmatmul.mubr.f32.gmra.mrb[2].mxu0 %v45_v14  ;;  %207 = vmatmul.mubr.f32.gmra.mrb[2].mxu1 %v49_v15 }
 0x12c   :  { %v190_v23 = vpop.f32.mrb[0].mxu0  ;;  %v202_v24 = vpop.f32.mrb[0].mxu1 }
 0x12d   :  { %v191_v25 = vadd.f32 %v190_v23, %v104_v21  ;;  %v203_v26 = vadd.f32 %v202_v24, %v104_v21  ;;  %v192_v27 = vpop.f32.mrb[1].mxu0  ;;  %v204_v28 = vpop.f32.mrb[1].mxu1 }
 0x12e   :  { %v193_v29 = vadd.f32 %v192_v27, %v108_v22  ;;  %v205_v30 = vadd.f32 %v204_v28, %v108_v22 }
 0x12f   :  { %213 = vst [vmem:[#allocation7] sm:$0xff] %v191_v25  ;;  %217 = vst [vmem:[#allocation7 + $0x20] sm:$0xff] %v203_v26 }
 0x130   :  { %214 = vst [vmem:[#allocation7 + $0x8] sm:$0xff] %v193_v29  ;;  %218 = vst [vmem:[#allocation7 + $0x28] sm:$0xff] %v205_v30  ;;  %v196_v31 = vpop.f32.mrb[2].mxu0  ;;  %v208_v32 = vpop.f32.mrb[2].mxu1 }
 0x131   :  { %v197_v33 = vadd.f32 %v196_v31, %v104_v21  ;;  %v209_v34 = vadd.f32 %v208_v32, %v104_v21  ;;  %v198_v35 = vpop.f32.mrb[3].mxu0  ;;  %v210_v36 = vpop.f32.mrb[3].mxu1 }
 0x132   :  { %v199_v37 = vadd.f32 %v198_v35, %v108_v22  ;;  %v211_v38 = vadd.f32 %v210_v36, %v108_v22 }
 0x133   :  { %215 = vst [vmem:[#allocation7 + $0x10] sm:$0xff] %v197_v33  ;;  %219 = vst [vmem:[#allocation7 + $0x30] sm:$0xff] %v209_v34 }
 0x134   :  { %216 = vst [vmem:[#allocation7 + $0x18] sm:$0xff] %v199_v37  ;;  %220 = vst [vmem:[#allocation7 + $0x38] sm:$0xff] %v211_v38 }
 0x135   :  { %375 = shalt.err (!%p372_p6)
}
 0x136   :  { %s376_s15 = scalar_lea.hbm %s472_s3, 1024 }
 0x137   :  { %p377_p7 = scmp.ne.s32.totalorder %s472_s3, %s376_s15  ;;  %p380_p8 = scmp.lt.u32.totalorder %s376_s15, %s472_s3 }
 0x139   :  { %p382_p9 = pnand %p380_p8, %p377_p7 }
 0x13b   :  { %385 = shalt.err (!%p382_p9)
}
 0x13c   :  { %232 = dma.vmem_to_hbm [thread:$0]  %s227_s12, 1024, %s472_s3, [#allocation4], %s393_s22, %s393_s22, %s394_s23  }
 0x13d   :  { %390 = dma.done.wait [#allocation4], 1024  }
 0x13e   :  { %391 = vsyncadd [#allocation4], 4294966272 }
 0x13f   :  { %236 = vsyncpa [#allocation3], 1 }
 0x140   :  { %237 = vsyncpa [#allocation6], 1 }
 0x141   :  { %238 = vsyncpa [#allocation4], 1 }

</bundles_post_ra>
